<compile_context>
chip_gen: v7x
topology: tpu7x:2x2x1
jax: 0.10.0
libtpu: 0.0.40
codegen_flags: <defaults>
</compile_context>

<pallas_src>
import math

import jax
import jax.numpy as jnp
from jax import lax
from jax.experimental import pallas as pl
from jax.experimental.pallas import tpu as pltpu


def _attention_kernel(vl_ref,               # (Bt, TQ, 1)  int32 valid lens
                      q_ref, k_ref, v_ref,  # (Bt, TQ, D) / (Bt, K, D) / (Bt, K, Dv)
                      out_ref, attn_ref):   # (Bt, TQ, Dv) / (Bt, TQ, K)
    q = q_ref[...]
    k = k_ref[...]
    v = v_ref[...]

    d = q.shape[-1]
    # Fold 1/sqrt(d) into Q (Q*D elements, not Q*K scores); operands stay in
    # their native dtype so bf16 callers hit the fast MXU path, while the
    # accumulation is forced to f32 via preferred_element_type.
    qs = q * jnp.asarray(1.0 / math.sqrt(d), dtype=q.dtype)

    # scores = Q @ K^T / sqrt(d): batched einsum contracts the last dims
    # directly — no explicit .T / XLU relayout of K before the MXU push.
    scores = jnp.einsum("bqd,bkd->bqk", qs, k,
                        preferred_element_type=jnp.float32)      # (Bt, TQ, K) f32

    # masked_softmax: key positions >= valid_len are set to -1e6 pre-softmax.
    vl = vl_ref[...]                                             # (Bt, TQ, 1)
    col = lax.broadcasted_iota(jnp.int32, scores.shape, 2)       # key position ids
    scores = jnp.where(col < vl, scores, jnp.float32(-1.0e6))

    # numerically-stable softmax along the key axis
    m = jnp.max(scores, axis=-1, keepdims=True)
    e = jnp.exp(scores - m)
    denom = jnp.sum(e, axis=-1, keepdims=True)
    inv = pl.reciprocal(denom, approx=True)      # EUP vrcp — its own VLIW slot
    inv = inv * (2.0 - denom * inv)              # one Newton step -> ~f32 accuracy
    w = e * inv                                  # (Bt, TQ, K)

    attn_ref[...] = w.astype(attn_ref.dtype)
    # output = attention_weights @ V (weights cast to V's dtype for the MXU).
    out_ref[...] = jnp.einsum(
        "bqk,bkv->bqv", w.astype(v.dtype), v,
        preferred_element_type=jnp.float32).astype(out_ref.dtype)


def _pick_tiles(B, Q, K, D, Dv, itemsize, budget_bytes=8 * 1024 * 1024):
    """Choose (Bt, TQ): pack as many batches per grid step as fit a conservative
    VMEM budget (double-buffering kept well under the 32 MiB scoped default /
    v7x 64 MiB physical), and a lane/MXU-friendly Q tile for large Q."""
    if Q > 512 and Q % 256 == 0:
        tq = 256
    elif Q > 512 and Q % 128 == 0:
        tq = 128
    else:
        tq = Q

    def block_bytes(bt):
        per_batch = (tq * D + K * D + K * Dv + tq * Dv) * itemsize  # q, k, v, out
        per_batch += tq * K * 4                                      # attn (f32)
        per_batch += tq * 4                                          # valid_lens
        return bt * per_batch

    bt = 1
    for cand in range(B, 0, -1):
        if B % cand == 0 and block_bytes(cand) <= budget_bytes:
            bt = cand
            break
    return bt, tq


@jax.jit
def dot_product_attention(queries, keys, values, valid_lens=None):
    """Pallas implementation of DotProductAttention.forward (eval mode).

    Returns (output, attention_weights), matching the PyTorch module.
    """
    B, Q, D = queries.shape
    _, K, Dk = keys.shape
    _, _, Dv = values.shape
    assert D == Dk

    if valid_lens is None:
        # No masking == every key position is valid.
        valid_lens = jnp.full((B,), K, dtype=jnp.int32)
    # Broadcast to (B, Q, 1) so it tiles cleanly alongside the Q tiling.
    vl_b = jnp.broadcast_to(valid_lens.astype(jnp.int32)[:, None, None], (B, Q, 1))

    itemsize = jnp.dtype(queries.dtype).itemsize
    Bt, TQ = _pick_tiles(B, Q, K, D, Dv, itemsize)
    nb, nq = B // Bt, Q // TQ

    grid_spec = pltpu.PrefetchScalarGridSpec(
        num_scalar_prefetch=0,
        grid=(nb, nq),
        in_specs=[
            pl.BlockSpec((Bt, TQ, 1), lambda b, qi: (b, qi, 0)),   # valid lens
            pl.BlockSpec((Bt, TQ, D), lambda b, qi: (b, qi, 0)),   # Q
            pl.BlockSpec((Bt, K, D), lambda b, qi: (b, 0, 0)),     # K
            pl.BlockSpec((Bt, K, Dv), lambda b, qi: (b, 0, 0)),    # V
        ],
        out_specs=[
            pl.BlockSpec((Bt, TQ, Dv), lambda b, qi: (b, qi, 0)),  # output
            pl.BlockSpec((Bt, TQ, K), lambda b, qi: (b, qi, 0)),   # attn weights
        ],
    )

    cost = pl.CostEstimate(
        flops=2 * B * Q * K * (D + Dv),
        transcendentals=B * Q * K,
        bytes_accessed=(B * Q * D + B * K * D + B * K * Dv + B * Q * Dv) * itemsize
                       + B * Q * K * 4 + B * Q * 4,
    )

    out, attn = pl.pallas_call(
        _attention_kernel,
        grid_spec=grid_spec,
        out_shape=(
            jax.ShapeDtypeStruct((B, Q, Dv), queries.dtype),
            jax.ShapeDtypeStruct((B, Q, K), jnp.float32),
        ),
        compiler_params=pltpu.CompilerParams(
            dimension_semantics=("parallel", "parallel"),
            vmem_limit_bytes=32 * 1024 * 1024,
        ),
        cost_estimate=cost,
    )(vl_b, queries, keys, values)
    return out, attn


def _reference(queries, keys, values, valid_lens):
    """Pure-JAX reference mirroring the PyTorch forward."""
    d = queries.shape[-1]
    scores = jnp.einsum("bqd,bkd->bqk", queries, keys) / math.sqrt(d)
    if valid_lens is not None:
        col = jnp.arange(scores.shape[-1])[None, None, :]
        mask = col < valid_lens[:, None, None]
        scores = jnp.where(mask, scores, -1.0e6)
    w = jax.nn.softmax(scores, axis=-1)
    return jnp.einsum("bqk,bkv->bqv", w, values), w


if __name__ == "__main__":
    key = jax.random.PRNGKey(0)
    B, Q, K, D, Dv = 2, 8, 8, 32, 32

    kq, kk, kv = jax.random.split(key, 3)
    queries = jax.random.normal(kq, (B, Q, D), dtype=jnp.float32)
    keys = jax.random.normal(kk, (B, K, D), dtype=jnp.float32)
    values = jax.random.normal(kv, (B, K, Dv), dtype=jnp.float32)
    valid_lens = jnp.array([5, 8], dtype=jnp.int32)

    out, attn = dot_product_attention(queries, keys, values, valid_lens)
    jax.block_until_ready((out, attn))

    ref_out, ref_attn = _reference(queries, keys, values, valid_lens)
    assert jnp.allclose(out, ref_out, atol=1e-4, rtol=1e-4)
    assert jnp.allclose(attn, ref_attn, atol=1e-4, rtol=1e-4)

    # Also exercise the valid_lens=None path.
    out2, attn2 = dot_product_attention(queries, keys, values, None)
    jax.block_until_ready((out2, attn2))
    ref_out2, ref_attn2 = _reference(queries, keys, values, None)
    assert jnp.allclose(out2, ref_out2, atol=1e-4, rtol=1e-4)
    assert jnp.allclose(attn2, ref_attn2, atol=1e-4, rtol=1e-4)

    print("KERNEL_OK")
</pallas_src>

<mosaic_0001>
module attributes {stable_mosaic.version = 11 : i64} {
  func.func @_attention_kernel(%arg0: i32, %arg1: i32, %arg2: memref<2x8x1xi32, #tpu.memory_space<vmem>>, %arg3: memref<2x8x32xf32, #tpu.memory_space<vmem>>, %arg4: memref<2x8x32xf32, #tpu.memory_space<vmem>>, %arg5: memref<2x8x32xf32, #tpu.memory_space<vmem>>, %arg6: memref<2x8x32xf32, #tpu.memory_space<vmem>>, %arg7: memref<2x8x8xf32, #tpu.memory_space<vmem>>) attributes {dimension_semantics = [#tpu.dimension_semantics<parallel>, #tpu.dimension_semantics<parallel>], iteration_bounds = array<i64: 1, 1>, scalar_prefetch = 0 : i64, scratch_operands = 0 : i64, tpu.core_type = #tpu.core_type<tc>, window_params = [{transform_indices = @transform_0, window_bounds = array<i64: 2, 8, 1>}, {transform_indices = @transform_1, window_bounds = array<i64: 2, 8, 32>}, {transform_indices = @transform_2, window_bounds = array<i64: 2, 8, 32>}, {transform_indices = @transform_3, window_bounds = array<i64: 2, 8, 32>}, {transform_indices = @transform_4, window_bounds = array<i64: 2, 8, 32>}, {transform_indices = @transform_5, window_bounds = array<i64: 2, 8, 8>}]} {
    %c0 = arith.constant 0 : index
    %c0_0 = arith.constant 0 : index
    %c0_1 = arith.constant 0 : index
    %0 = vector.load %arg3[%c0, %c0_0, %c0_1] : memref<2x8x32xf32, #tpu.memory_space<vmem>>, vector<2x8x32xf32>
    %c0_2 = arith.constant 0 : index
    %c0_3 = arith.constant 0 : index
    %c0_4 = arith.constant 0 : index
    %1 = vector.load %arg4[%c0_2, %c0_3, %c0_4] : memref<2x8x32xf32, #tpu.memory_space<vmem>>, vector<2x8x32xf32>
    %c0_5 = arith.constant 0 : index
    %c0_6 = arith.constant 0 : index
    %c0_7 = arith.constant 0 : index
    %2 = vector.load %arg5[%c0_5, %c0_6, %c0_7] : memref<2x8x32xf32, #tpu.memory_space<vmem>>, vector<2x8x32xf32>
    %cst = arith.constant 0.176776692 : f32
    %3 = vector.broadcast %cst : f32 to vector<2x8x32xf32>
    %4 = arith.mulf %0, %3 : vector<2x8x32xf32>
    "tpu.trace_start"() <{level = 10 : i32, message = "bqd,bkd->bqk"}> : () -> ()
    %cst_8 = arith.constant dense<0.000000e+00> : vector<2x8x8xf32>
    %5 = tpu.matmul %4, %1, %cst_8 {dimension_numbers = #tpu.dot_dimension_numbers<[2], [2], [1], [1], [0, 0, 0, 1, 1, 1], [0], [0]>} : vector<2x8x32xf32>, vector<2x8x32xf32>, vector<2x8x8xf32> -> vector<2x8x8xf32>
    "tpu.trace_stop"() : () -> ()
    %c0_9 = arith.constant 0 : index
    %c0_10 = arith.constant 0 : index
    %c0_11 = arith.constant 0 : index
    %6 = vector.load %arg2[%c0_9, %c0_10, %c0_11] : memref<2x8x1xi32, #tpu.memory_space<vmem>>, vector<2x8x1xi32>
    %7 = tpu.iota {dimensions = array<i32: 2>} : vector<2x8x8xi32>
    %8 = vector.broadcast %6 : vector<2x8x1xi32> to vector<2x8x8xi32>
    %9 = arith.cmpi slt, %7, %8 : vector<2x8x8xi32>
    %cst_12 = arith.constant -1.000000e+06 : f32
    %10 = vector.broadcast %cst_12 : f32 to vector<2x8x8xf32>
    %11 = arith.select %9, %5, %10 : vector<2x8x8xi1>, vector<2x8x8xf32>
    %cst_13 = arith.constant dense<0xFF800000> : vector<2x8xf32>
    %12 = vector.multi_reduction <maximumf>, %11, %cst_13 [2] : vector<2x8x8xf32> to vector<2x8xf32>
    %13 = vector.shape_cast %12 : vector<2x8xf32> to vector<2x8x1xf32>
    %14 = vector.broadcast %13 : vector<2x8x1xf32> to vector<2x8x8xf32>
    %15 = arith.subf %11, %14 : vector<2x8x8xf32>
    %16 = math.exp %15 : vector<2x8x8xf32>
    %cst_14 = arith.constant dense<0.000000e+00> : vector<2x8xf32>
    %17 = vector.multi_reduction <add>, %16, %cst_14 [2] : vector<2x8x8xf32> to vector<2x8xf32>
    %18 = vector.shape_cast %17 : vector<2x8xf32> to vector<2x8x1xf32>
    %19 = tpu.reciprocal %18 {approx = true} : vector<2x8x1xf32> -> vector<2x8x1xf32>
    %20 = arith.mulf %18, %19 : vector<2x8x1xf32>
    %cst_15 = arith.constant 2.000000e+00 : f32
    %21 = vector.broadcast %cst_15 : f32 to vector<2x8x1xf32>
    %22 = arith.subf %21, %20 : vector<2x8x1xf32>
    %23 = arith.mulf %19, %22 : vector<2x8x1xf32>
    %24 = vector.broadcast %23 : vector<2x8x1xf32> to vector<2x8x8xf32>
    %25 = arith.mulf %16, %24 : vector<2x8x8xf32>
    %c0_16 = arith.constant 0 : index
    %c0_17 = arith.constant 0 : index
    %c0_18 = arith.constant 0 : index
    %26 = vector.load %arg7[%c0_16, %c0_17, %c0_18] : memref<2x8x8xf32, #tpu.memory_space<vmem>>, vector<2x8x8xf32>
    tpu.vector_store %arg7[%c0_16, %c0_17, %c0_18], %25 {strides = array<i32>} : memref<2x8x8xf32, #tpu.memory_space<vmem>>, vector<2x8x8xf32>,
    "tpu.trace_start"() <{level = 10 : i32, message = "bqk,bkv->bqv"}> : () -> ()
    %cst_19 = arith.constant dense<0.000000e+00> : vector<2x8x32xf32>
    %27 = tpu.matmul %25, %2, %cst_19 {dimension_numbers = #tpu.dot_dimension_numbers<[2], [1], [1], [2], [0, 0, 0, 1, 1, 2], [0], [0]>} : vector<2x8x8xf32>, vector<2x8x32xf32>, vector<2x8x32xf32> -> vector<2x8x32xf32>
    "tpu.trace_stop"() : () -> ()
    %c0_20 = arith.constant 0 : index
    %c0_21 = arith.constant 0 : index
    %c0_22 = arith.constant 0 : index
    %28 = vector.load %arg6[%c0_20, %c0_21, %c0_22] : memref<2x8x32xf32, #tpu.memory_space<vmem>>, vector<2x8x32xf32>
    tpu.vector_store %arg6[%c0_20, %c0_21, %c0_22], %27 {strides = array<i32>} : memref<2x8x32xf32, #tpu.memory_space<vmem>>, vector<2x8x32xf32>,
    return
  }
  func.func @transform_0(%arg0: i32, %arg1: i32) -> (i32, i32, i32) {
    %c0_i32 = arith.constant 0 : i32
    %c0_i32_0 = arith.constant 0 : i32
    return %arg0, %arg1, %c0_i32 : i32, i32, i32
  }
  func.func @transform_1(%arg0: i32, %arg1: i32) -> (i32, i32, i32) {
    %c0_i32 = arith.constant 0 : i32
    %c0_i32_0 = arith.constant 0 : i32
    return %arg0, %arg1, %c0_i32 : i32, i32, i32
  }
  func.func @transform_2(%arg0: i32, %arg1: i32) -> (i32, i32, i32) {
    %c0_i32 = arith.constant 0 : i32
    %c0_i32_0 = arith.constant 0 : i32
    %c0_i32_1 = arith.constant 0 : i32
    return %arg0, %c0_i32, %c0_i32_0 : i32, i32, i32
  }
  func.func @transform_3(%arg0: i32, %arg1: i32) -> (i32, i32, i32) {
    %c0_i32 = arith.constant 0 : i32
    %c0_i32_0 = arith.constant 0 : i32
    %c0_i32_1 = arith.constant 0 : i32
    return %arg0, %c0_i32, %c0_i32_0 : i32, i32, i32
  }
  func.func @transform_4(%arg0: i32, %arg1: i32) -> (i32, i32, i32) {
    %c0_i32 = arith.constant 0 : i32
    %c0_i32_0 = arith.constant 0 : i32
    return %arg0, %arg1, %c0_i32 : i32, i32, i32
  }
  func.func @transform_5(%arg0: i32, %arg1: i32) -> (i32, i32, i32) {
    %c0_i32 = arith.constant 0 : i32
    %c0_i32_0 = arith.constant 0 : i32
    return %arg0, %arg1, %c0_i32 : i32, i32, i32
  }
}

</mosaic_0001>

<bundles_post_ra>
// kernel: dot_product_attention.1
= control target key start
LH: loop header
LB: loop body
LE: loop exit
PB: predicated region body
PF: predicated region fallthrough
CT: control target
= control target key end

     0   :  { %11 = vsyncpa [#allocation3], 0  ;;  %s714_s0 = inlined_call_operand.vmem [shape: s32[2,8,1], index: 0, kind: input, shape index: {}]   ;;  %s715_s1 = inlined_call_operand.vmem [shape: f32[2,8,32], index: 1, kind: input, shape index: {}]   ;;  %s716_s2 = inlined_call_operand.hbm [shape: f32[2,8,32], index: 2, kind: input, shape index: {}]   ;;  %s717_s3 = inlined_call_operand.hbm [shape: f32[2,8,32], index: 3, kind: input, shape index: {}]   ;;  %s718_s4 = inlined_call_operand.hbm [shape: f32[2,8,32], index: 4, kind: output, shape index: {0}]   ;;  %s719_s5 = inlined_call_operand.hbm [shape: f32[2,8,8], index: 5, kind: output, shape index: {1}]  }
   0x1   :  { %12 = vsyncpa [#allocation6], 0 }
   0x2   :  { %13 = vsyncpa [#allocation4], 0 }
   0x3   :  { %14 = vsyncpa [#allocation9], 0  ;;  %s585_s18 = smov [#allocation2]   ;;  %s489_s22 = scalar_lea.hbm %s716_s2, 256 }
   0x4   :  { %s24_s19 = sshll.u32 %s585_s18, 4  ;;  %p490_p0 = scmp.ne.s32.totalorder %s716_s2, %s489_s22  ;;  %s25_s19 = int_to_ptr.vmem [resolvable:$true] %s24_s19 }
   0x5   :  { %p493_p1 = scmp.lt.u32.totalorder %s489_s22, %s716_s2 }
   0x7   :  { %p495_p2 = pnand %p493_p1, %p490_p0 }
   0x9   :  { %498 = shalt.err (!%p495_p2)
}
   0xa   :  { %s499_s27 = scalar_lea.vmem %s25_s19, 256  ;;  %p504_p4 = scmp.lt.s32.totalorder %s25_s19, %s25_s19 }
   0xb   :  { %p500_p3 = scmp.ne.s32.totalorder %s25_s19, %s499_s27  ;;  %p505_p5 = scmp.lt.s32.totalorder %s499_s27, %s499_s27 }
   0xd   :  { %p506_p6 = por %p505_p5, %p504_p4 }
   0xf   :  { %p507_p7 = pnand %p506_p6, %p500_p3 }
  0x11   :  { %510 = shalt.err (!%p507_p7)
}
  0x12   :  { %s586_s28 = smov 128   ;;  %s587_s29 = smov 8  }
  0x13   :  { %30 = dma.hbm_to_vmem [thread:$0]  %s716_s2, 256, %s25_s19, [#allocation3], %s586_s28, %s586_s28, %s587_s29  }
  0x14   :  { %s588_s7 = smov [#allocation5]   ;;  %s511_s11 = scalar_lea.hbm %s717_s3, 256 }
  0x15   :  { %s36_s8 = sshll.u32 %s588_s7, 4  ;;  %p512_p8 = scmp.ne.s32.totalorder %s717_s3, %s511_s11  ;;  %s37_s8 = int_to_ptr.vmem [resolvable:$true] %s36_s8 }
  0x16   :  { %p515_p9 = scmp.lt.u32.totalorder %s511_s11, %s717_s3 }
  0x18   :  { %p517_p10 = pnand %p515_p9, %p512_p8 }
  0x1a   :  { %520 = shalt.err (!%p517_p10)
}
  0x1b   :  { %s521_s16 = scalar_lea.vmem %s37_s8, 256  ;;  %p526_p12 = scmp.lt.s32.totalorder %s37_s8, %s37_s8 }
  0x1c   :  { %p522_p11 = scmp.ne.s32.totalorder %s37_s8, %s521_s16  ;;  %p527_p13 = scmp.lt.s32.totalorder %s521_s16, %s521_s16 }
  0x1e   :  { %p528_p0 = por %p527_p13, %p526_p12 }
  0x20   :  { %p529_p1 = pnand %p528_p0, %p522_p11 }
  0x22   :  { %532 = shalt.err (!%p529_p1)
}
  0x23   :  { %42 = dma.hbm_to_vmem [thread:$0]  %s717_s3, 256, %s37_s8, [#allocation6], %s586_s28, %s586_s28, %s587_s29  }
  0x24   :  { %577 = dma.done.wait [#allocation3], 256  }
  0x25   :  { %578 = vsyncadd [#allocation3], 4294967040 }
  0x26   :  { %579 = dma.done.wait [#allocation6], 256  }
  0x27   :  { %580 = vsyncadd [#allocation6], 4294967040  ;;  %v589_v0 = vmov 0.0   ;;  %vm590_vm0 = vmmov 0   ;;  %v591_v1 = vmov 0   ;;  %vm57_vm1 = vcmask 261120  }
  0x28   :  { %451 = vmatprep.subr.mxu0 %v589_v0  ;;  %456 = vmatprep.subr.mxu1 %v589_v0  ;;  %v51_v2 = vld [vmem:[#allocation2] sm:$0xff]  ;;  %v52_v3 = vld [vmem:[#allocation2 + $0x8] sm:$0xff]  ;;  %v212_v10 = vlaneseq  ;;  %vm224_vm3 = vcmask 64512   ;;  %v53_v32 = vld [vmem:[#allocation5] sm:$0xff] }
  0x29   :  { %453 = vmatprep.mubr.msk.f32.mxu0 %vm590_vm0, %v589_v0  ;;  %458 = vmatprep.mubr.msk.f32.mxu1 %vm590_vm0, %v589_v0  ;;  %v49_v4 = vld [vmem:[%s715_s1] sm:$0xff]  ;;  %v50_v6 = vld [vmem:[%s715_s1 + $0x8] sm:$0xff]  ;;  %v54_v33 = vld [vmem:[#allocation5 + $0x8] sm:$0xff] }
  0x2a   :  { %480 = vset.pattern.permute.xlu0 %v591_v1  ;;  %452 = vmatpush3.xpose.msk.msra.mxu0 %vm57_vm1, %v51_v2  ;;  %v55_v5 = vmul.f32 0.17677669, %v49_v4  ;;  %v210_v7 = vld [vmem:[%s714_s0] sm:$0xff]  ;;  %v56_v8 = vmul.f32 0.17677669, %v50_v6  ;;  %v211_v9 = vld [vmem:[%s714_s0 + $0x8] sm:$0xff] }
  0x2b   :  { %457 = vmatpush3.xpose.msk.msra.mxu1 %vm57_vm1, %v52_v3  ;;  %215 = vperm.xlu0 %480, %v210_v7   ;;  %v213_v12 = vand.u32 127, %v212_v10  ;;  %s592_s0 = smov [#allocation8]  }
  0x2c   :  { %461 = vmatprep.subr.mxu0 %v589_v0  ;;  %466 = vmatprep.subr.mxu1 %v589_v0  ;;  %s420_s1 = sshll.u32 %s592_s0, 4  ;;  %s421_s1 = int_to_ptr.vmem [resolvable:$true] %s420_s1 }
  0x2d   :  { %454 = vmatmul.mubr.msk.f32.vlgmr.msra.gmra.mrb[0].mxu0 %vm57_vm1, %v55_v5  ;;  %s533_s25 = scalar_lea.vmem %s421_s1, 256  ;;  %p538_p3 = scmp.lt.s32.totalorder %s421_s1, %s421_s1 }
  0x2e   :  { %459 = vmatmul.mubr.msk.f32.vlgmr.msra.gmra.mrb[0].mxu1 %vm57_vm1, %v56_v8  ;;  %463 = vmatprep.mubr.msk.f32.mxu0 %vm590_vm0, %v589_v0  ;;  %p534_p2 = scmp.ne.s32.totalorder %s421_s1, %s533_s25  ;;  %p539_p4 = scmp.lt.s32.totalorder %s533_s25, %s533_s25 }
  0x2f   :  { %468 = vmatprep.mubr.msk.f32.mxu1 %vm590_vm0, %v589_v0  ;;  %218 = vperm.xlu0 %480, %v211_v9  }
  0x30   :  { %462 = vmatpush3.msra.mxu0 %v53_v32  ;;  %467 = vmatpush3.msra.mxu1 %v54_v33  ;;  %p540_p5 = por %p539_p4, %p538_p3 }
  0x32   :  { %p541_p6 = pnand %p540_p5, %p534_p2 }
  0xaa   :  { %v216_v11 = vpop.permute.xlu0 %215 }
  0xab   :  { %vm220_vm2 = vcmp.lt.s32.totalorder %v213_v12, %v216_v11 }
  0xae   :  { %v219_v13 = vpop.permute.xlu0 %218 }
  0xaf   :  { %vm221_vm4 = vcmp.lt.s32.totalorder %v213_v12, %v219_v13 }
 0x100   :  { %v130_v14 = vpop.f32.mrb[0].mxu0 }
 0x101   :  { %v206_v15 = vpop.f32.mrb[0].mxu1  ;;  %v222_v16 = vsel %vm220_vm2, %v130_v14, -1000000.0  ;;  %v455_v17 = vpop.f32.mrb[1].mxu0 }
 0x102   :  { %v460_v18 = vpop.f32.mrb[1].mxu1  ;;  %v225_v19 = vsel %vm224_vm3, %v222_v16, -inf  ;;  %v223_v20 = vsel %vm221_vm4, %v206_v15, -1000000.0 }
 0x103   :  { %226 = vmax.xlane.f32.xlu1 %v225_v19  ;;  %v228_v21 = vsel %vm224_vm3, %v223_v20, -inf }
 0x107   :  { %229 = vmax.xlane.f32.xlu1 %v228_v21 }
 0x190   :  { %v227_v22 = vpop.xlane.xlu1 %226 }
 0x191   :  { %v231_v23 = vsub.f32 %v222_v16, %v227_v22 }
 0x193   :  { %v233_v24 = vmul.f32 1.442695, %v231_v23 }
 0x194   :  { %v230_v25 = vpop.xlane.xlu1 %229 }
 0x195   :  { %481 = vpow2.f32 %v233_v24  ;;  %v232_v26 = vsub.f32 %v223_v20, %v230_v25 }
 0x197   :  { %v235_v27 = vmul.f32 1.442695, %v232_v26 }
 0x199   :  { %483 = vpow2.f32 %v235_v27 }
 0x19f   :  { %v482_v28 = vpop.eup %481 }
 0x1a0   :  { %v237_v29 = vsel %vm224_vm3, %v482_v28, 0.0 }
 0x1a1   :  { %238 = vadd.xlane.f32.xlu0 %v237_v29 }
 0x1a3   :  { %v484_v30 = vpop.eup %483 }
 0x1a4   :  { %v240_v31 = vsel %vm224_vm3, %v484_v30, 0.0 }
 0x1a5   :  { %241 = vadd.xlane.f32.xlu1 %v240_v31 }
 0x22e   :  { %v239_v34 = vpop.xlane.xlu0 %238 }
 0x22f   :  { %485 = vrcp.f32 %v239_v34 }
 0x232   :  { %v242_v35 = vpop.xlane.xlu1 %241 }
 0x233   :  { %487 = vrcp.f32 %v242_v35 }
 0x239   :  { %v486_v36 = vpop.eup %485 }
 0x23a   :  { %v245_v37 = vmul.f32 %v486_v36, %v239_v34 }
 0x23c   :  { %v247_v38 = vsub.f32 2.0, %v245_v37 }
 0x23d   :  { %v488_v39 = vpop.eup %487 }
 0x23e   :  { %v249_v40 = vmul.f32 %v486_v36, %v247_v38  ;;  %v246_v41 = vmul.f32 %v488_v39, %v242_v35 }
 0x240   :  { %v251_v42 = vmul.f32 %v482_v28, %v249_v40  ;;  %v248_v43 = vsub.f32 2.0, %v246_v41 }
 0x242   :  { %253 = vst.msk [vmem:[#allocation8] sm:$0xff] %vm224_vm3, %v251_v42  ;;  %v250_v44 = vmul.f32 %v488_v39, %v248_v43  ;;  %464 = vmatmul.mubr.msk.f32.vlgmr.msra.gmra.mrb[2].mxu0 %vm224_vm3, %v251_v42 }
 0x244   :  { %v252_v45 = vmul.f32 %v484_v30, %v250_v44 }
 0x246   :  { %254 = vst.msk [vmem:[#allocation8 + $0x8] sm:$0xff] %vm224_vm3, %v252_v45  ;;  %469 = vmatmul.mubr.msk.f32.vlgmr.msra.gmra.mrb[2].mxu1 %vm224_vm3, %v252_v45 }
 0x247   :  { %544 = shalt.err (!%p541_p6)
}
 0x248   :  { %s545_s30 = scalar_lea.hbm %s719_s5, 256 }
 0x249   :  { %p546_p7 = scmp.ne.s32.totalorder %s719_s5, %s545_s30  ;;  %p549_p8 = scmp.lt.u32.totalorder %s545_s30, %s719_s5 }
 0x24b   :  { %p551_p9 = pnand %p549_p8, %p546_p7 }
 0x24d   :  { %554 = shalt.err (!%p551_p9)
}
 0x24e   :  { %426 = dma.vmem_to_hbm [thread:$0]  %s421_s1, 256, %s719_s5, [#allocation9], %s586_s28, %s586_s28, %s587_s29  }
 0x24f   :  { %s593_s12 = smov [#allocation7]  }
 0x250   :  { %s408_s13 = sshll.u32 %s593_s12, 4  ;;  %s409_s13 = int_to_ptr.vmem [resolvable:$true] %s408_s13 }
 0x251   :  { %s555_s14 = scalar_lea.vmem %s409_s13, 256  ;;  %p560_p11 = scmp.lt.s32.totalorder %s409_s13, %s409_s13 }
 0x252   :  { %p556_p10 = scmp.ne.s32.totalorder %s409_s13, %s555_s14  ;;  %p561_p12 = scmp.lt.s32.totalorder %s555_s14, %s555_s14 }
 0x254   :  { %p562_p13 = por %p561_p12, %p560_p11 }
 0x256   :  { %p563_p0 = pnand %p562_p13, %p556_p10 }
 0x315   :  { %v324_v46 = vpop.f32.mrb[2].mxu0 }
 0x316   :  { %401 = vst.msk [vmem:[#allocation7] sm:$0xff] %vm57_vm1, %v324_v46  ;;  %v465_v47 = vpop.f32.mrb[3].mxu0 }
 0x319   :  { %v397_v48 = vpop.f32.mrb[2].mxu1 }
 0x31a   :  { %402 = vst.msk [vmem:[#allocation7 + $0x8] sm:$0xff] %vm57_vm1, %v397_v48  ;;  %v470_v49 = vpop.f32.mrb[3].mxu1 }
 0x31b   :  { %566 = shalt.err (!%p563_p0)
}
 0x31c   :  { %s567_s16 = scalar_lea.hbm %s718_s4, 256 }
 0x31d   :  { %p568_p1 = scmp.ne.s32.totalorder %s718_s4, %s567_s16  ;;  %p571_p2 = scmp.lt.u32.totalorder %s567_s16, %s718_s4 }
 0x31f   :  { %p573_p3 = pnand %p571_p2, %p568_p1 }
 0x321   :  { %576 = shalt.err (!%p573_p3)
}
 0x322   :  { %414 = dma.vmem_to_hbm [thread:$0]  %s409_s13, 256, %s718_s4, [#allocation4], %s586_s28, %s586_s28, %s587_s29  }
 0x323   :  { %581 = dma.done.wait [#allocation4], 256  }
 0x324   :  { %582 = vsyncadd [#allocation4], 4294967040 }
 0x325   :  { %583 = dma.done.wait [#allocation9], 256  }
 0x326   :  { %584 = vsyncadd [#allocation9], 4294967040 }
 0x327   :  { %433 = vsyncpa [#allocation3], 1 }
 0x328   :  { %434 = vsyncpa [#allocation6], 1 }
 0x329   :  { %435 = vsyncpa [#allocation4], 1 }
 0x32a   :  { %436 = vsyncpa [#allocation9], 1 }

</bundles_post_ra>
